<compile_context>
chip_gen: v5e
topology: v5e:2x2
jax: 0.10.0
libtpu: 0.0.40
codegen_flags: <defaults>
</compile_context>

<pallas_src>
import functools

import jax
import jax.numpy as jnp
from jax import lax
from jax.experimental import pallas as pl
from jax.experimental.pallas import tpu as pltpu


def _seq2seq_kernel(x_ref, wih_t_ref, whh_t_ref, b_ref, wfc_t_ref, bfc_ref,
                    out_ref, h_scratch):
    """LSTM recurrence + hoisted FC head, all resident in VMEM.

    x_ref    : (B, E)        input embedding (logically repeated over T steps)
    wih_t_ref: (E, 4H)       LSTM input weights, pre-transposed    (mxu dtype)
    whh_t_ref: (H, 4H)       LSTM recurrent weights, pre-transposed (mxu dtype)
    b_ref    : (1, 4H)       b_ih + b_hh (float32)
    wfc_t_ref: (H, Cp)       Linear weight, pre-transposed, lane-padded (mxu dtype)
    bfc_ref  : (1, Cp)       Linear bias, lane-padded (float32)
    out_ref  : (B*T, Cp)     lane-dense logits slab, BATCH-major (row = b*T + t)
    h_scratch: (T, B, H)     VMEM scratch of per-step hidden states (float32)
    """
    B = x_ref.shape[0]
    H = whh_t_ref.shape[0]
    T = h_scratch.shape[0]
    mxu_dtype = whh_t_ref.dtype          # f32 by default; bf16 option for v6e/v7x MXU

    # ---- Loop-invariant work, hoisted off the serial critical path -------------
    whh_t = whh_t_ref[...]                                               # (H, 4H)
    # x is the same vector every time step, so the input projection (+ fused bias
    # broadcast) is computed exactly once.  Elementwise math stays float32.
    xg = jnp.dot(x_ref[...].astype(mxu_dtype), wih_t_ref[...],
                 preferred_element_type=jnp.float32) + b_ref[...]        # (B, 4H)

    # ---- Peeled step 0: h0 = c0 = 0  =>  gates = xg, c1 = i*g (no h@W_hh, no f*c)
    # PyTorch LSTM gate order: input, forget, cell (g), output.
    # NOTE: the lane-offset gate slices (0/H/2H/3H) lower to XLU selects; the XLU
    # slot has slack here, and they disappear entirely once H is a multiple of 128.
    sig0 = jax.nn.sigmoid(xg)
    tanh0 = jnp.tanh(xg)
    c = sig0[:, 0 * H:1 * H] * tanh0[:, 2 * H:3 * H]
    h = sig0[:, 3 * H:4 * H] * jnp.tanh(c)
    h_scratch[0] = h

    # ---- Remaining serial LSTM steps (T is static & small: full Python unroll) --
    for t in range(1, T):
        gates = xg + jnp.dot(h.astype(mxu_dtype), whh_t,
                             preferred_element_type=jnp.float32)         # (B, 4H)
        # Two full-width EUP passes over the whole (B, 4H) tile; slice afterwards.
        sig_all = jax.nn.sigmoid(gates)
        tanh_all = jnp.tanh(gates)
        i = sig_all[:, 0 * H:1 * H]
        f = sig_all[:, 1 * H:2 * H]
        g = tanh_all[:, 2 * H:3 * H]
        o = sig_all[:, 3 * H:4 * H]
        c = f * c + i * g
        h = o * jnp.tanh(c)
        h_scratch[t] = h                                                 # (B, H)

    # ---- FC head hoisted out of the loop: batch-major relayout + one matmul -----
    hs_tbh = h_scratch[...]                                              # (T, B, H)
    # Static concat of per-batch slices -> rows ordered b-major (row = b*T + t),
    # so the wrapper never needs a separate transpose kernel.
    hs = jnp.concatenate([hs_tbh[:, b, :] for b in range(B)], axis=0)    # (B*T, H)
    out_ref[...] = jnp.dot(hs.astype(mxu_dtype), wfc_t_ref[...],
                           preferred_element_type=jnp.float32) + bfc_ref[...]


def prepare_params(w_ih, w_hh, b_ih, b_hh, w_fc, b_fc, *, mxu_dtype=jnp.float32):
    """One-time (model-init) weight preprocessing — deliberately OUT of the hot path.

    mxu_dtype: keep float32 for exact validation; jnp.bfloat16 is the recommended
    setting for production on v6e/v7x (native bf16 MXU passes); all elementwise /
    EUP math in the kernel stays float32 either way (required on v5e).
    """
    H = w_hh.shape[1]
    C = w_fc.shape[0]
    C_pad = ((C + 127) // 128) * 128    # lane-dense output slab (unmasked stores)

    wih_t = jnp.asarray(w_ih, jnp.float32).T.astype(mxu_dtype)            # (E, 4H)
    whh_t = jnp.asarray(w_hh, jnp.float32).T.astype(mxu_dtype)            # (H, 4H)
    b = (jnp.asarray(b_ih, jnp.float32)
         + jnp.asarray(b_hh, jnp.float32)).reshape(1, -1)                 # (1, 4H)
    wfc_t = jnp.zeros((H, C_pad), mxu_dtype).at[:, :C].set(
        jnp.asarray(w_fc, jnp.float32).T.astype(mxu_dtype))               # (H, Cp)
    bfc = jnp.zeros((1, C_pad), jnp.float32).at[:, :C].set(
        jnp.asarray(b_fc, jnp.float32).reshape(1, -1))                    # (1, Cp)
    return wih_t, whh_t, b, wfc_t, bfc


@functools.partial(jax.jit, static_argnames=("seq_len", "num_classes"))
def seq2seq_forward(x, wih_t, whh_t, b, wfc_t, bfc, *, seq_len, num_classes):
    """Hot path: pallas_call + pad-stripping slice only.
    x: (B, E) -> returns (B, seq_len, num_classes) float32."""
    B, _ = x.shape
    H = whh_t.shape[0]
    C_pad = wfc_t.shape[1]
    T = seq_len

    vmem = pl.BlockSpec(memory_space=pltpu.MemorySpace.VMEM)
    out_slab = pl.pallas_call(
        _seq2seq_kernel,
        out_shape=jax.ShapeDtypeStruct((B * T, C_pad), jnp.float32),
        in_specs=[vmem] * 6,
        out_specs=vmem,
        scratch_shapes=[pltpu.VMEM((T, B, H), jnp.float32)],
    )(x.astype(jnp.float32), wih_t, whh_t, b, wfc_t, bfc)
    # TODO(synk): at production sizes do NOT keep this gridless whole-resident design:
    #   grid over B (dimension_semantics=("parallel",...) -> shards across v7x's 2 TCs),
    #   stream the FC head over T-chunks with an auto-pipelined output BlockSpec,
    #   set pltpu.CompilerParams(vmem_limit_bytes=...) explicitly, and size tiles for
    #   v7x's 64 MiB VMEM (~half a v6e plan); pick H a multiple of 128 (4H mult. of 256).

    # Slab is already batch-major (row = b*T + t): only strip the lane padding.
    return out_slab.reshape(B, T, C_pad)[:, :, :num_classes]


def _reference_forward(x, w_ih, w_hh, b_ih, b_hh, w_fc, b_fc, seq_len):
    """Pure-JAX reference matching PyTorch LSTM + Linear semantics."""
    B = x.shape[0]
    H = w_hh.shape[1]
    xg = x @ w_ih.T + b_ih + b_hh

    def step(carry, _):
        h, c = carry
        gates = xg + h @ w_hh.T
        i, f, g, o = jnp.split(gates, 4, axis=-1)
        i, f, o = jax.nn.sigmoid(i), jax.nn.sigmoid(f), jax.nn.sigmoid(o)
        g = jnp.tanh(g)
        c_new = f * c + i * g
        h_new = o * jnp.tanh(c_new)
        return (h_new, c_new), h_new

    (_, _), hs = lax.scan(step, (jnp.zeros((B, H)), jnp.zeros((B, H))),
                          None, length=seq_len)
    hs = jnp.transpose(hs, (1, 0, 2))            # (B, T, H)
    return hs @ w_fc.T + b_fc


if __name__ == "__main__":
    # Small, deterministic config consistent with
    # Seq2Seq(embedding_dim, hidden_dim, num_classes, seq_len).
    batch = 4
    embedding_dim = 16
    hidden_dim = 32
    num_classes = 8
    seq_len = 8

    key = jax.random.PRNGKey(0)
    kx, k1, k2, k3, k4, k5, k6 = jax.random.split(key, 7)

    # PyTorch-style uniform(-1/sqrt(H), 1/sqrt(H)) init (deterministic, synthetic).
    s = 1.0 / jnp.sqrt(hidden_dim)
    w_ih = jax.random.uniform(k1, (4 * hidden_dim, embedding_dim), jnp.float32, -s, s)
    w_hh = jax.random.uniform(k2, (4 * hidden_dim, hidden_dim), jnp.float32, -s, s)
    b_ih = jax.random.uniform(k3, (4 * hidden_dim,), jnp.float32, -s, s)
    b_hh = jax.random.uniform(k4, (4 * hidden_dim,), jnp.float32, -s, s)
    w_fc = jax.random.uniform(k5, (num_classes, hidden_dim), jnp.float32, -s, s)
    b_fc = jax.random.uniform(k6, (num_classes,), jnp.float32, -s, s)

    x = jax.random.normal(kx, (batch, embedding_dim), jnp.float32)

    # One-time weight prep (init time), then the lean jitted hot path.
    params = prepare_params(w_ih, w_hh, b_ih, b_hh, w_fc, b_fc,
                            mxu_dtype=jnp.float32)
    out = seq2seq_forward(x, *params, seq_len=seq_len, num_classes=num_classes)
    out = jax.block_until_ready(out)
    assert out.shape == (batch, seq_len, num_classes), out.shape

    ref = _reference_forward(x, w_ih, w_hh, b_ih, b_hh, w_fc, b_fc, seq_len)
    assert jnp.allclose(out, ref, atol=1e-5, rtol=1e-5), \
        float(jnp.max(jnp.abs(out - ref)))

    print("KERNEL_OK")
</pallas_src>

<mosaic_0001>
module attributes {stable_mosaic.version = 11 : i64} {
  func.func @_seq2seq_kernel(%arg0: memref<4x16xf32, #tpu.memory_space<vmem>>, %arg1: memref<16x128xf32, #tpu.memory_space<vmem>>, %arg2: memref<32x128xf32, #tpu.memory_space<vmem>>, %arg3: memref<1x128xf32, #tpu.memory_space<vmem>>, %arg4: memref<32x128xf32, #tpu.memory_space<vmem>>, %arg5: memref<1x128xf32, #tpu.memory_space<vmem>>, %arg6: memref<32x128xf32, #tpu.memory_space<vmem>>, %arg7: memref<8x4x32xf32, #tpu.memory_space<vmem>>) attributes {dimension_semantics = [], scalar_prefetch = 0 : i64, scratch_operands = 1 : i64, tpu.core_type = #tpu.core_type<tc>} {
    %c0 = arith.constant 0 : index
    %c0_0 = arith.constant 0 : index
    %0 = vector.load %arg2[%c0, %c0_0] : memref<32x128xf32, #tpu.memory_space<vmem>>, vector<32x128xf32>
    %c0_1 = arith.constant 0 : index
    %c0_2 = arith.constant 0 : index
    %1 = vector.load %arg0[%c0_1, %c0_2] : memref<4x16xf32, #tpu.memory_space<vmem>>, vector<4x16xf32>
    %c0_3 = arith.constant 0 : index
    %c0_4 = arith.constant 0 : index
    %2 = vector.load %arg1[%c0_3, %c0_4] : memref<16x128xf32, #tpu.memory_space<vmem>>, vector<16x128xf32>
    %cst = arith.constant dense<0.000000e+00> : vector<4x128xf32>
    %3 = tpu.matmul %1, %2, %cst {dimension_numbers = #tpu.dot_dimension_numbers<[1], [0], [0], [1], [0, 0, 1, 1], [], []>} : vector<4x16xf32>, vector<16x128xf32>, vector<4x128xf32> -> vector<4x128xf32>
    %c0_5 = arith.constant 0 : index
    %c0_6 = arith.constant 0 : index
    %4 = vector.load %arg3[%c0_5, %c0_6] : memref<1x128xf32, #tpu.memory_space<vmem>>, vector<1x128xf32>
    %5 = vector.broadcast %4 : vector<1x128xf32> to vector<4x128xf32>
    %6 = arith.addf %3, %5 : vector<4x128xf32>
    %7 = arith.negf %6 : vector<4x128xf32>
    %8 = math.exp %7 : vector<4x128xf32>
    %cst_7 = arith.constant 1.000000e+00 : f32
    %9 = vector.broadcast %cst_7 : f32 to vector<4x128xf32>
    %10 = arith.addf %9, %8 : vector<4x128xf32>
    %11 = arith.divf %9, %10 : vector<4x128xf32>
    %12 = math.tanh %6 : vector<4x128xf32>
    %13 = vector.extract_strided_slice %11 {offsets = [0, 0], sizes = [4, 32], strides = [1, 1]} : vector<4x128xf32> to vector<4x32xf32>
    %14 = vector.extract_strided_slice %12 {offsets = [0, 64], sizes = [4, 32], strides = [1, 1]} : vector<4x128xf32> to vector<4x32xf32>
    %15 = arith.mulf %13, %14 : vector<4x32xf32>
    %16 = vector.extract_strided_slice %11 {offsets = [0, 96], sizes = [4, 32], strides = [1, 1]} : vector<4x128xf32> to vector<4x32xf32>
    %17 = math.tanh %15 : vector<4x32xf32>
    %18 = arith.mulf %16, %17 : vector<4x32xf32>
    %c0_8 = arith.constant 0 : index
    %c0_9 = arith.constant 0 : index
    %c0_10 = arith.constant 0 : index
    %19 = vector.load %arg7[%c0_8, %c0_9, %c0_10] : memref<8x4x32xf32, #tpu.memory_space<vmem>>, vector<1x4x32xf32>
    %20 = vector.shape_cast %19 : vector<1x4x32xf32> to vector<4x32xf32>
    %21 = vector.shape_cast %18 : vector<4x32xf32> to vector<1x4x32xf32>
    tpu.vector_store %arg7[%c0_8, %c0_9, %c0_10], %21 {strides = array<i32>} : memref<8x4x32xf32, #tpu.memory_space<vmem>>, vector<1x4x32xf32>,
    %cst_11 = arith.constant dense<0.000000e+00> : vector<4x128xf32>
    %22 = tpu.matmul %18, %0, %cst_11 {dimension_numbers = #tpu.dot_dimension_numbers<[1], [0], [0], [1], [0, 0, 1, 1], [], []>} : vector<4x32xf32>, vector<32x128xf32>, vector<4x128xf32> -> vector<4x128xf32>
    %23 = arith.addf %6, %22 : vector<4x128xf32>
    %24 = arith.negf %23 : vector<4x128xf32>
    %25 = math.exp %24 : vector<4x128xf32>
    %cst_12 = arith.constant 1.000000e+00 : f32
    %26 = vector.broadcast %cst_12 : f32 to vector<4x128xf32>
    %27 = arith.addf %26, %25 : vector<4x128xf32>
    %28 = arith.divf %26, %27 : vector<4x128xf32>
    %29 = math.tanh %23 : vector<4x128xf32>
    %30 = vector.extract_strided_slice %28 {offsets = [0, 0], sizes = [4, 32], strides = [1, 1]} : vector<4x128xf32> to vector<4x32xf32>
    %31 = vector.extract_strided_slice %28 {offsets = [0, 32], sizes = [4, 32], strides = [1, 1]} : vector<4x128xf32> to vector<4x32xf32>
    %32 = vector.extract_strided_slice %29 {offsets = [0, 64], sizes = [4, 32], strides = [1, 1]} : vector<4x128xf32> to vector<4x32xf32>
    %33 = vector.extract_strided_slice %28 {offsets = [0, 96], sizes = [4, 32], strides = [1, 1]} : vector<4x128xf32> to vector<4x32xf32>
    %34 = arith.mulf %31, %15 : vector<4x32xf32>
    %35 = arith.mulf %30, %32 : vector<4x32xf32>
    %36 = arith.addf %34, %35 : vector<4x32xf32>
    %37 = math.tanh %36 : vector<4x32xf32>
    %38 = arith.mulf %33, %37 : vector<4x32xf32>
    %c1 = arith.constant 1 : index
    %c0_13 = arith.constant 0 : index
    %c0_14 = arith.constant 0 : index
    %39 = vector.load %arg7[%c1, %c0_13, %c0_14] : memref<8x4x32xf32, #tpu.memory_space<vmem>>, vector<1x4x32xf32>
    %40 = vector.shape_cast %39 : vector<1x4x32xf32> to vector<4x32xf32>
    %41 = vector.shape_cast %38 : vector<4x32xf32> to vector<1x4x32xf32>
    tpu.vector_store %arg7[%c1, %c0_13, %c0_14], %41 {strides = array<i32>} : memref<8x4x32xf32, #tpu.memory_space<vmem>>, vector<1x4x32xf32>,
    %cst_15 = arith.constant dense<0.000000e+00> : vector<4x128xf32>
    %42 = tpu.matmul %38, %0, %cst_15 {dimension_numbers = #tpu.dot_dimension_numbers<[1], [0], [0], [1], [0, 0, 1, 1], [], []>} : vector<4x32xf32>, vector<32x128xf32>, vector<4x128xf32> -> vector<4x128xf32>
    %43 = arith.addf %6, %42 : vector<4x128xf32>
    %44 = arith.negf %43 : vector<4x128xf32>
    %45 = math.exp %44 : vector<4x128xf32>
    %cst_16 = arith.constant 1.000000e+00 : f32
    %46 = vector.broadcast %cst_16 : f32 to vector<4x128xf32>
    %47 = arith.addf %46, %45 : vector<4x128xf32>
    %48 = arith.divf %46, %47 : vector<4x128xf32>
    %49 = math.tanh %43 : vector<4x128xf32>
    %50 = vector.extract_strided_slice %48 {offsets = [0, 0], sizes = [4, 32], strides = [1, 1]} : vector<4x128xf32> to vector<4x32xf32>
    %51 = vector.extract_strided_slice %48 {offsets = [0, 32], sizes = [4, 32], strides = [1, 1]} : vector<4x128xf32> to vector<4x32xf32>
    %52 = vector.extract_strided_slice %49 {offsets = [0, 64], sizes = [4, 32], strides = [1, 1]} : vector<4x128xf32> to vector<4x32xf32>
    %53 = vector.extract_strided_slice %48 {offsets = [0, 96], sizes = [4, 32], strides = [1, 1]} : vector<4x128xf32> to vector<4x32xf32>
    %54 = arith.mulf %51, %36 : vector<4x32xf32>
    %55 = arith.mulf %50, %52 : vector<4x32xf32>
    %56 = arith.addf %54, %55 : vector<4x32xf32>
    %57 = math.tanh %56 : vector<4x32xf32>
    %58 = arith.mulf %53, %57 : vector<4x32xf32>
    %c2 = arith.constant 2 : index
    %c0_17 = arith.constant 0 : index
    %c0_18 = arith.constant 0 : index
    %59 = vector.load %arg7[%c2, %c0_17, %c0_18] : memref<8x4x32xf32, #tpu.memory_space<vmem>>, vector<1x4x32xf32>
    %60 = vector.shape_cast %59 : vector<1x4x32xf32> to vector<4x32xf32>
    %61 = vector.shape_cast %58 : vector<4x32xf32> to vector<1x4x32xf32>
    tpu.vector_store %arg7[%c2, %c0_17, %c0_18], %61 {strides = array<i32>} : memref<8x4x32xf32, #tpu.memory_space<vmem>>, vector<1x4x32xf32>,
    %cst_19 = arith.constant dense<0.000000e+00> : vector<4x128xf32>
    %62 = tpu.matmul %58, %0, %cst_19 {dimension_numbers = #tpu.dot_dimension_numbers<[1], [0], [0], [1], [0, 0, 1, 1], [], []>} : vector<4x32xf32>, vector<32x128xf32>, vector<4x128xf32> -> vector<4x128xf32>
    %63 = arith.addf %6, %62 : vector<4x128xf32>
    %64 = arith.negf %63 : vector<4x128xf32>
    %65 = math.exp %64 : vector<4x128xf32>
    %cst_20 = arith.constant 1.000000e+00 : f32
    %66 = vector.broadcast %cst_20 : f32 to vector<4x128xf32>
    %67 = arith.addf %66, %65 : vector<4x128xf32>
    %68 = arith.divf %66, %67 : vector<4x128xf32>
    %69 = math.tanh %63 : vector<4x128xf32>
    %70 = vector.extract_strided_slice %68 {offsets = [0, 0], sizes = [4, 32], strides = [1, 1]} : vector<4x128xf32> to vector<4x32xf32>
    %71 = vector.extract_strided_slice %68 {offsets = [0, 32], sizes = [4, 32], strides = [1, 1]} : vector<4x128xf32> to vector<4x32xf32>
    %72 = vector.extract_strided_slice %69 {offsets = [0, 64], sizes = [4, 32], strides = [1, 1]} : vector<4x128xf32> to vector<4x32xf32>
    %73 = vector.extract_strided_slice %68 {offsets = [0, 96], sizes = [4, 32], strides = [1, 1]} : vector<4x128xf32> to vector<4x32xf32>
    %74 = arith.mulf %71, %56 : vector<4x32xf32>
    %75 = arith.mulf %70, %72 : vector<4x32xf32>
    %76 = arith.addf %74, %75 : vector<4x32xf32>
    %77 = math.tanh %76 : vector<4x32xf32>
    %78 = arith.mulf %73, %77 : vector<4x32xf32>
    %c3 = arith.constant 3 : index
    %c0_21 = arith.constant 0 : index
    %c0_22 = arith.constant 0 : index
    %79 = vector.load %arg7[%c3, %c0_21, %c0_22] : memref<8x4x32xf32, #tpu.memory_space<vmem>>, vector<1x4x32xf32>
    %80 = vector.shape_cast %79 : vector<1x4x32xf32> to vector<4x32xf32>
    %81 = vector.shape_cast %78 : vector<4x32xf32> to vector<1x4x32xf32>
    tpu.vector_store %arg7[%c3, %c0_21, %c0_22], %81 {strides = array<i32>} : memref<8x4x32xf32, #tpu.memory_space<vmem>>, vector<1x4x32xf32>,
    %cst_23 = arith.constant dense<0.000000e+00> : vector<4x128xf32>
    %82 = tpu.matmul %78, %0, %cst_23 {dimension_numbers = #tpu.dot_dimension_numbers<[1], [0], [0], [1], [0, 0, 1, 1], [], []>} : vector<4x32xf32>, vector<32x128xf32>, vector<4x128xf32> -> vector<4x128xf32>
    %83 = arith.addf %6, %82 : vector<4x128xf32>
    %84 = arith.negf %83 : vector<4x128xf32>
    %85 = math.exp %84 : vector<4x128xf32>
    %cst_24 = arith.constant 1.000000e+00 : f32
    %86 = vector.broadcast %cst_24 : f32 to vector<4x128xf32>
    %87 = arith.addf %86, %85 : vector<4x128xf32>
    %88 = arith.divf %86, %87 : vector<4x128xf32>
    %89 = math.tanh %83 : vector<4x128xf32>
    %90 = vector.extract_strided_slice %88 {offsets = [0, 0], sizes = [4, 32], strides = [1, 1]} : vector<4x128xf32> to vector<4x32xf32>
    %91 = vector.extract_strided_slice %88 {offsets = [0, 32], sizes = [4, 32], strides = [1, 1]} : vector<4x128xf32> to vector<4x32xf32>
    %92 = vector.extract_strided_slice %89 {offsets = [0, 64], sizes = [4, 32], strides = [1, 1]} : vector<4x128xf32> to vector<4x32xf32>
    %93 = vector.extract_strided_slice %88 {offsets = [0, 96], sizes = [4, 32], strides = [1, 1]} : vector<4x128xf32> to vector<4x32xf32>
    %94 = arith.mulf %91, %76 : vector<4x32xf32>
    %95 = arith.mulf %90, %92 : vector<4x32xf32>
    %96 = arith.addf %94, %95 : vector<4x32xf32>
    %97 = math.tanh %96 : vector<4x32xf32>
    %98 = arith.mulf %93, %97 : vector<4x32xf32>
    %c4 = arith.constant 4 : index
    %c0_25 = arith.constant 0 : index
    %c0_26 = arith.constant 0 : index
    %99 = vector.load %arg7[%c4, %c0_25, %c0_26] : memref<8x4x32xf32, #tpu.memory_space<vmem>>, vector<1x4x32xf32>
    %100 = vector.shape_cast %99 : vector<1x4x32xf32> to vector<4x32xf32>
    %101 = vector.shape_cast %98 : vector<4x32xf32> to vector<1x4x32xf32>
    tpu.vector_store %arg7[%c4, %c0_25, %c0_26], %101 {strides = array<i32>} : memref<8x4x32xf32, #tpu.memory_space<vmem>>, vector<1x4x32xf32>,
    %cst_27 = arith.constant dense<0.000000e+00> : vector<4x128xf32>
    %102 = tpu.matmul %98, %0, %cst_27 {dimension_numbers = #tpu.dot_dimension_numbers<[1], [0], [0], [1], [0, 0, 1, 1], [], []>} : vector<4x32xf32>, vector<32x128xf32>, vector<4x128xf32> -> vector<4x128xf32>
    %103 = arith.addf %6, %102 : vector<4x128xf32>
    %104 = arith.negf %103 : vector<4x128xf32>
    %105 = math.exp %104 : vector<4x128xf32>
    %cst_28 = arith.constant 1.000000e+00 : f32
    %106 = vector.broadcast %cst_28 : f32 to vector<4x128xf32>
    %107 = arith.addf %106, %105 : vector<4x128xf32>
    %108 = arith.divf %106, %107 : vector<4x128xf32>
    %109 = math.tanh %103 : vector<4x128xf32>
    %110 = vector.extract_strided_slice %108 {offsets = [0, 0], sizes = [4, 32], strides = [1, 1]} : vector<4x128xf32> to vector<4x32xf32>
    %111 = vector.extract_strided_slice %108 {offsets = [0, 32], sizes = [4, 32], strides = [1, 1]} : vector<4x128xf32> to vector<4x32xf32>
    %112 = vector.extract_strided_slice %109 {offsets = [0, 64], sizes = [4, 32], strides = [1, 1]} : vector<4x128xf32> to vector<4x32xf32>
    %113 = vector.extract_strided_slice %108 {offsets = [0, 96], sizes = [4, 32], strides = [1, 1]} : vector<4x128xf32> to vector<4x32xf32>
    %114 = arith.mulf %111, %96 : vector<4x32xf32>
    %115 = arith.mulf %110, %112 : vector<4x32xf32>
    %116 = arith.addf %114, %115 : vector<4x32xf32>
    %117 = math.tanh %116 : vector<4x32xf32>
    %118 = arith.mulf %113, %117 : vector<4x32xf32>
    %c5 = arith.constant 5 : index
    %c0_29 = arith.constant 0 : index
    %c0_30 = arith.constant 0 : index
    %119 = vector.load %arg7[%c5, %c0_29, %c0_30] : memref<8x4x32xf32, #tpu.memory_space<vmem>>, vector<1x4x32xf32>
    %120 = vector.shape_cast %119 : vector<1x4x32xf32> to vector<4x32xf32>
    %121 = vector.shape_cast %118 : vector<4x32xf32> to vector<1x4x32xf32>
    tpu.vector_store %arg7[%c5, %c0_29, %c0_30], %121 {strides = array<i32>} : memref<8x4x32xf32, #tpu.memory_space<vmem>>, vector<1x4x32xf32>,
    %cst_31 = arith.constant dense<0.000000e+00> : vector<4x128xf32>
    %122 = tpu.matmul %118, %0, %cst_31 {dimension_numbers = #tpu.dot_dimension_numbers<[1], [0], [0], [1], [0, 0, 1, 1], [], []>} : vector<4x32xf32>, vector<32x128xf32>, vector<4x128xf32> -> vector<4x128xf32>
    %123 = arith.addf %6, %122 : vector<4x128xf32>
    %124 = arith.negf %123 : vector<4x128xf32>
    %125 = math.exp %124 : vector<4x128xf32>
    %cst_32 = arith.constant 1.000000e+00 : f32
    %126 = vector.broadcast %cst_32 : f32 to vector<4x128xf32>
    %127 = arith.addf %126, %125 : vector<4x128xf32>
    %128 = arith.divf %126, %127 : vector<4x128xf32>
    %129 = math.tanh %123 : vector<4x128xf32>
    %130 = vector.extract_strided_slice %128 {offsets = [0, 0], sizes = [4, 32], strides = [1, 1]} : vector<4x128xf32> to vector<4x32xf32>
    %131 = vector.extract_strided_slice %128 {offsets = [0, 32], sizes = [4, 32], strides = [1, 1]} : vector<4x128xf32> to vector<4x32xf32>
    %132 = vector.extract_strided_slice %129 {offsets = [0, 64], sizes = [4, 32], strides = [1, 1]} : vector<4x128xf32> to vector<4x32xf32>
    %133 = vector.extract_strided_slice %128 {offsets = [0, 96], sizes = [4, 32], strides = [1, 1]} : vector<4x128xf32> to vector<4x32xf32>
    %134 = arith.mulf %131, %116 : vector<4x32xf32>
    %135 = arith.mulf %130, %132 : vector<4x32xf32>
    %136 = arith.addf %134, %135 : vector<4x32xf32>
    %137 = math.tanh %136 : vector<4x32xf32>
    %138 = arith.mulf %133, %137 : vector<4x32xf32>
    %c6 = arith.constant 6 : index
    %c0_33 = arith.constant 0 : index
    %c0_34 = arith.constant 0 : index
    %139 = vector.load %arg7[%c6, %c0_33, %c0_34] : memref<8x4x32xf32, #tpu.memory_space<vmem>>, vector<1x4x32xf32>
    %140 = vector.shape_cast %139 : vector<1x4x32xf32> to vector<4x32xf32>
    %141 = vector.shape_cast %138 : vector<4x32xf32> to vector<1x4x32xf32>
    tpu.vector_store %arg7[%c6, %c0_33, %c0_34], %141 {strides = array<i32>} : memref<8x4x32xf32, #tpu.memory_space<vmem>>, vector<1x4x32xf32>,
    %cst_35 = arith.constant dense<0.000000e+00> : vector<4x128xf32>
    %142 = tpu.matmul %138, %0, %cst_35 {dimension_numbers = #tpu.dot_dimension_numbers<[1], [0], [0], [1], [0, 0, 1, 1], [], []>} : vector<4x32xf32>, vector<32x128xf32>, vector<4x128xf32> -> vector<4x128xf32>
    %143 = arith.addf %6, %142 : vector<4x128xf32>
    %144 = arith.negf %143 : vector<4x128xf32>
    %145 = math.exp %144 : vector<4x128xf32>
    %cst_36 = arith.constant 1.000000e+00 : f32
    %146 = vector.broadcast %cst_36 : f32 to vector<4x128xf32>
    %147 = arith.addf %146, %145 : vector<4x128xf32>
    %148 = arith.divf %146, %147 : vector<4x128xf32>
    %149 = math.tanh %143 : vector<4x128xf32>
    %150 = vector.extract_strided_slice %148 {offsets = [0, 0], sizes = [4, 32], strides = [1, 1]} : vector<4x128xf32> to vector<4x32xf32>
    %151 = vector.extract_strided_slice %148 {offsets = [0, 32], sizes = [4, 32], strides = [1, 1]} : vector<4x128xf32> to vector<4x32xf32>
    %152 = vector.extract_strided_slice %149 {offsets = [0, 64], sizes = [4, 32], strides = [1, 1]} : vector<4x128xf32> to vector<4x32xf32>
    %153 = vector.extract_strided_slice %148 {offsets = [0, 96], sizes = [4, 32], strides = [1, 1]} : vector<4x128xf32> to vector<4x32xf32>
    %154 = arith.mulf %151, %136 : vector<4x32xf32>
    %155 = arith.mulf %150, %152 : vector<4x32xf32>
    %156 = arith.addf %154, %155 : vector<4x32xf32>
    %157 = math.tanh %156 : vector<4x32xf32>
    %158 = arith.mulf %153, %157 : vector<4x32xf32>
    %c7 = arith.constant 7 : index
    %c0_37 = arith.constant 0 : index
    %c0_38 = arith.constant 0 : index
    %159 = vector.load %arg7[%c7, %c0_37, %c0_38] : memref<8x4x32xf32, #tpu.memory_space<vmem>>, vector<1x4x32xf32>
    %160 = vector.shape_cast %159 : vector<1x4x32xf32> to vector<4x32xf32>
    %161 = vector.shape_cast %158 : vector<4x32xf32> to vector<1x4x32xf32>
    tpu.vector_store %arg7[%c7, %c0_37, %c0_38], %161 {strides = array<i32>} : memref<8x4x32xf32, #tpu.memory_space<vmem>>, vector<1x4x32xf32>,
    %c0_39 = arith.constant 0 : index
    %c0_40 = arith.constant 0 : index
    %c0_41 = arith.constant 0 : index
    %162 = vector.load %arg7[%c0_39, %c0_40, %c0_41] : memref<8x4x32xf32, #tpu.memory_space<vmem>>, vector<8x4x32xf32>
    %163 = vector.extract_strided_slice %162 {offsets = [0, 0, 0], sizes = [8, 1, 32], strides = [1, 1, 1]} : vector<8x4x32xf32> to vector<8x1x32xf32>
    %164 = vector.shape_cast %163 : vector<8x1x32xf32> to vector<8x32xf32>
    %165 = vector.extract_strided_slice %162 {offsets = [0, 1, 0], sizes = [8, 1, 32], strides = [1, 1, 1]} : vector<8x4x32xf32> to vector<8x1x32xf32>
    %166 = vector.shape_cast %165 : vector<8x1x32xf32> to vector<8x32xf32>
    %167 = vector.extract_strided_slice %162 {offsets = [0, 2, 0], sizes = [8, 1, 32], strides = [1, 1, 1]} : vector<8x4x32xf32> to vector<8x1x32xf32>
    %168 = vector.shape_cast %167 : vector<8x1x32xf32> to vector<8x32xf32>
    %169 = vector.extract_strided_slice %162 {offsets = [0, 3, 0], sizes = [8, 1, 32], strides = [1, 1, 1]} : vector<8x4x32xf32> to vector<8x1x32xf32>
    %170 = vector.shape_cast %169 : vector<8x1x32xf32> to vector<8x32xf32>
    %171 = tpu.concatenate %164, %166, %168, %170 in 0 : vector<8x32xf32>, vector<8x32xf32>, vector<8x32xf32>, vector<8x32xf32> -> vector<32x32xf32>
    %c0_42 = arith.constant 0 : index
    %c0_43 = arith.constant 0 : index
    %172 = vector.load %arg4[%c0_42, %c0_43] : memref<32x128xf32, #tpu.memory_space<vmem>>, vector<32x128xf32>
    %cst_44 = arith.constant dense<0.000000e+00> : vector<32x128xf32>
    %173 = tpu.matmul %171, %172, %cst_44 {dimension_numbers = #tpu.dot_dimension_numbers<[1], [0], [0], [1], [0, 0, 1, 1], [], []>} : vector<32x32xf32>, vector<32x128xf32>, vector<32x128xf32> -> vector<32x128xf32>
    %c0_45 = arith.constant 0 : index
    %c0_46 = arith.constant 0 : index
    %174 = vector.load %arg5[%c0_45, %c0_46] : memref<1x128xf32, #tpu.memory_space<vmem>>, vector<1x128xf32>
    %175 = vector.broadcast %174 : vector<1x128xf32> to vector<32x128xf32>
    %176 = arith.addf %173, %175 : vector<32x128xf32>
    %c0_47 = arith.constant 0 : index
    %c0_48 = arith.constant 0 : index
    %177 = vector.load %arg6[%c0_47, %c0_48] : memref<32x128xf32, #tpu.memory_space<vmem>>, vector<32x128xf32>
    tpu.vector_store %arg6[%c0_47, %c0_48], %176 {strides = array<i32>} : memref<32x128xf32, #tpu.memory_space<vmem>>, vector<32x128xf32>,
    return
  }
}

</mosaic_0001>

<bundles_post_ra>
// kernel: seq2seq_forward.1
= control target key start
LH: loop header
LB: loop body
LE: loop exit
PB: predicated region body
PF: predicated region fallthrough
CT: control target
= control target key end

     0   :  { %11 = vsyncpa [#allocation4], 0  ;;  %s1168_s0 = inlined_call_operand.hbm [shape: f32[4,16], index: 0, kind: input, shape index: {}]   ;;  %s1169_s1 = inlined_call_operand.hbm [shape: f32[16,128], index: 1, kind: input, shape index: {}]   ;;  %s1170_s2 = inlined_call_operand.hbm [shape: f32[32,128], index: 2, kind: input, shape index: {}]   ;;  %s1171_s3 = inlined_call_operand.vmem [shape: f32[1,128], index: 3, kind: input, shape index: {}]   ;;  %s1172_s4 = inlined_call_operand.hbm [shape: f32[32,128], index: 4, kind: input, shape index: {}]   ;;  %s1173_s5 = inlined_call_operand.vmem [shape: f32[1,128], index: 5, kind: input, shape index: {}]   ;;  %s1174_s6 = inlined_call_operand.hbm [shape: f32[32,128], index: 6, kind: output, shape index: {}]  }
   0x1   :  { %12 = vsyncpa [#allocation7], 0 }
   0x2   :  { %13 = vsyncpa [#allocation10], 0  ;;  %s30_s23 = sshll.u32 %s1169_s1, 4  ;;  %s31_s23 = int_to_ptr.hbm [resolvable:$true] %s30_s23 }
   0x3   :  { %14 = vsyncpa [#allocation5], 0  ;;  %s1001_s24 = smov [#allocation6]   ;;  %s20_s28 = sshll.u32 %s1168_s0, 4  ;;  %s21_s28 = int_to_ptr.hbm [resolvable:$true] %s20_s28 }
   0x4   :  { %s32_s25 = sshll.u32 %s1001_s24, 4  ;;  %s1002_s29 = smov 128   ;;  %s33_s25 = int_to_ptr.vmem [resolvable:$true] %s32_s25 }
   0x5   :  { %s1003_s30 = smov 8   ;;  %s1004_s7 = smov [#allocation3]  }
   0x6   :  { %38 = dma.hbm_to_vmem [thread:$0]  %s31_s23, 256, %s33_s25, [#allocation7], %s1002_s29, %s1002_s29, %s1003_s30  }
   0x7   :  { %s22_s8 = sshll.u32 %s1004_s7, 4  ;;  %s43_s10 = sshll.u32 %s1170_s2, 4  ;;  %s23_s8 = int_to_ptr.vmem [resolvable:$true] %s22_s8  ;;  %s44_s10 = int_to_ptr.hbm [resolvable:$true] %s43_s10 }
   0x8   :  { %25 = dma.hbm_to_vmem [thread:$0]  %s21_s28, 64, %s23_s8, [#allocation4]  }
   0x9   :  { %s58_s0 = sshll.u32 %s1172_s4, 4  ;;  %s1005_s13 = smov [#allocation8]   ;;  %s59_s0 = int_to_ptr.hbm [resolvable:$true] %s58_s0 }
   0xa   :  { %s45_s14 = sshll.u32 %s1005_s13, 4  ;;  %s1006_s15 = smov [#allocation9]   ;;  %s46_s14 = int_to_ptr.vmem [resolvable:$true] %s45_s14 }
   0xb   :  { %51 = dma.hbm_to_vmem [thread:$0]  %s44_s10, 512, %s46_s14, [#allocation7], %s1002_s29, %s1002_s29, %s1003_s30  }
   0xc   :  { %s60_s16 = sshll.u32 %s1006_s15, 4  ;;  %s61_s16 = int_to_ptr.vmem [resolvable:$true] %s60_s16 }
   0xd   :  { %66 = dma.hbm_to_vmem [thread:$0]  %s59_s0, 512, %s61_s16, [#allocation10], %s1002_s29, %s1002_s29, %s1003_s30  }
   0xe   :  { %993 = dma.done.wait [#allocation4], 64  }
   0xf   :  { %994 = vsyncadd [#allocation4], 4294967232 }
  0x10   :  { %995 = dma.done.wait [#allocation7], 768  }
  0x11   :  { %996 = vsyncadd [#allocation7], 4294966528 }
  0x12   :  { %997 = dma.done.wait [#allocation10], 512  }
  0x13   :  { %998 = vsyncadd [#allocation10], 4294966784  ;;  %v91_v0 = vld [vmem:[#allocation6 + $0x8] sm:$0xff]  ;;  %v90_v1 = vld [vmem:[#allocation6] sm:$0xff]  ;;  %vm96_vm0 = vcmask 130048   ;;  %s1007_s17 = smov 64  }
  0x14   :  { %114 = vmatpush.msra.mxu3 %v91_v0  ;;  %v89_v2 = vld [vmem:[#allocation3] sm:$0xf]  ;;  %s1009_s18 = smov 96   ;;  %v88_v23 = vld [vmem:[#allocation8 + $0x18] sm:$0xff]  ;;  %v87_v24 = vld [vmem:[#allocation8 + $0x10] sm:$0xff]  ;;  %vm155_vm5 = vcmask 257024  }
  0x15   :  { %v807_v3 = vld [vmem:[%s1171_s3] ss:$0 sm:$0xff]  ;;  %s1008_s3 = smov 32   ;;  %172 = vmatpush.msra.mxu2 %v88_v23  ;;  %374 = vmatpush.msra.mxu0 %v88_v23  ;;  %v85_v28 = vld [vmem:[#allocation8] sm:$0xff]  ;;  %vm157_vm6 = vcmask 261120   ;;  %s1010_s21 = smov [#allocation11]  }
  0x16   :  { %115 = vmatpush.msra.mxu3 %v90_v1  ;;  %v86_v25 = vld [vmem:[#allocation8 + $0x8] sm:$0xff]  ;;  %440 = vmatpush.msra.mxu1 %v88_v23  ;;  %s756_s22 = sshll.u32 %s1010_s21, 4  ;;  %s758_s25 = sshll.u32 %s1174_s6, 4  ;;  %s757_s22 = int_to_ptr.vmem [resolvable:$true] %s756_s22  ;;  %s759_s25 = int_to_ptr.hbm [resolvable:$true] %s758_s25 }
  0x17   :  { %773 = vmatmul.msk.f32.vlgmr.msra.gmra.mxu3 %vm96_vm0, %v89_v2  ;;  %173 = vmatpush.msra.mxu2 %v87_v24 }
  0x18   :  { %308 = vmatpush.msrb.mxu3 %v88_v23  ;;  %375 = vmatpush.msra.mxu0 %v87_v24 }
  0x19   :  { %441 = vmatpush.msra.mxu1 %v87_v24  ;;  %174 = vmatpush.msra.mxu2 %v86_v25 }
  0x1a   :  { %309 = vmatpush.msrb.mxu3 %v87_v24  ;;  %376 = vmatpush.msra.mxu0 %v86_v25 }
  0x1b   :  { %442 = vmatpush.msra.mxu1 %v86_v25  ;;  %175 = vmatpush.msra.mxu2 %v85_v28 }
  0x1c   :  { %310 = vmatpush.msrb.mxu3 %v86_v25  ;;  %377 = vmatpush.msra.mxu0 %v85_v28 }
  0x1d   :  { %242 = vmatpush.msrb.mxu2 %v88_v23  ;;  %443 = vmatpush.msra.mxu1 %v85_v28 }
  0x1e   :  { %311 = vmatpush.msrb.mxu3 %v85_v28 }
  0x1f   :  { %243 = vmatpush.msrb.mxu2 %v87_v24 }
  0x20   :  { %572 = vmatpush.msra.mxu3 %v88_v23 }
  0x21   :  { %244 = vmatpush.msrb.mxu2 %v86_v25 }
  0x22   :  { %573 = vmatpush.msra.mxu3 %v87_v24 }
  0x23   :  { %245 = vmatpush.msrb.mxu2 %v85_v28 }
  0x24   :  { %574 = vmatpush.msra.mxu3 %v86_v25 }
  0x26   :  { %575 = vmatpush.msra.mxu3 %v85_v28 }
  0x9a   :  { %v117_v4 = vpop.f32.mrf.mxu3 }
  0x9b   :  { %v1070_v5 = vadd.f32 %v807_v3, %v117_v4 }
  0x9d   :  { %809 = vtanh.f32 %v1070_v5  ;;  %v774_v7 = vmul.f32 -1.442695, %v1070_v5 }
  0x9f   :  { %811 = vpow2.f32 %v774_v7 }
  0xa3   :  { %v810_v6 = vpop.eup %809 }
  0xa4   :  { %141 = vrot.lane.b32.xlu0 %v810_v6, %s1007_s17 }
  0xa5   :  { %v812_v8 = vpop.eup %811 }
  0xa6   :  { %v123_v9 = vadd.f32 1.0, %v812_v8 }
  0xa8   :  { %813 = vrcp.f32 %v123_v9  ;;  %v135_v15 = vand.u32 2147483648, %v123_v9  ;;  %vm129_vm2 = vweird.f32 %v123_v9  ;;  %v133_v16 = vand.u32 2147483647, %v123_v9 }
  0xaa   :  { %v136_v18 = vor.u32 1.1754944e-38, %v135_v15  ;;  %vm134_vm4 = vcmp.eq.f32.partialorder %v133_v16, 8.507059e+37 }
  0xae   :  { %v814_v10 = vpop.eup %813 }
  0xaf   :  { %v125_v11 = vmul.f32 %v814_v10, %v123_v9  ;;  %vm130_vm1 = vweird.f32 %v814_v10 }
  0xb0   :  { %vm131_vm3 = vmor %vm129_vm2, %vm130_vm1 }
  0xb1   :  { %v126_v12 = vsub.f32 1.0, %v125_v11 }
  0xb3   :  { %v127_v13 = vmul.f32 %v814_v10, %v126_v12 }
  0xb5   :  { %v128_v14 = vadd.f32 %v814_v10, %v127_v13 }
  0xb7   :  { %v132_v17 = vsel %vm131_vm3, %v814_v10, %v128_v14 }
  0xb8   :  { %v137_v20 = vsel %vm134_vm4, %v136_v18, %v132_v17 }
 0x116   :  { %v142_v19 = vpop.permute.xlu0 %141 }
 0x117   :  { %v144_v21 = vmul.f32 %v142_v19, %v137_v20 }
 0x119   :  { %815 = vtanh.f32 %v144_v21  ;;  %202 = vrot.lane.b32.xlu2 %v144_v21, %s1008_s3 }
 0x11f   :  { %v816_v22 = vpop.eup %815 }
 0x120   :  { %147 = vrot.lane.b32.xlu0 %v816_v22, %s1009_s18 }
 0x173   :  { %v203_v48 = vpop.permute.xlu2 %202 }
 0x192   :  { %v148_v26 = vpop.permute.xlu0 %147 }
 0x193   :  { %v150_v27 = vmul.f32 %v148_v26, %v137_v20 }
 0x195   :  { %152 = vrot.lane.b32.xlu1 %v150_v27, %s1008_s3 }
 0x207   :  { %v153_v29 = vpop.permute.xlu1 %152 }
 0x208   :  { %156 = vst.msk [vmem:[#allocation2] sm:$0xf] %vm155_vm5, %v153_v29  ;;  %775 = vmatmul.msk.f32.vlgmr.msra.gmra.mxu2 %vm157_vm6, %v153_v29 }
 0x209   :  { %506 = vmatpush.msra.mxu2 %v88_v23 }
 0x20b   :  { %507 = vmatpush.msra.mxu2 %v87_v24 }
 0x20d   :  { %508 = vmatpush.msra.mxu2 %v86_v25 }
 0x20f   :  { %509 = vmatpush.msra.mxu2 %v85_v28 }
 0x28b   :  { %v177_v30 = vpop.f32.mrf.mxu2 }
 0x28c   :  { %v180_v31 = vadd.f32 %v177_v30, %v1070_v5 }
 0x28e   :  { %817 = vtanh.f32 %v180_v31  ;;  %v776_v33 = vmul.f32 -1.442695, %v180_v31 }
 0x290   :  { %819 = vpow2.f32 %v776_v33 }
 0x294   :  { %v818_v32 = vpop.eup %817 }
 0x295   :  { %207 = vrot.lane.b32.xlu1 %v818_v32, %s1007_s17 }
 0x296   :  { %v820_v34 = vpop.eup %819 }
 0x297   :  { %v184_v35 = vadd.f32 1.0, %v820_v34 }
 0x299   :  { %821 = vrcp.f32 %v184_v35  ;;  %v196_v41 = vand.u32 2147483648, %v184_v35  ;;  %vm190_vm8 = vweird.f32 %v184_v35  ;;  %v194_v42 = vand.u32 2147483647, %v184_v35 }
 0x29b   :  { %v197_v44 = vor.u32 1.1754944e-38, %v196_v41  ;;  %vm195_vm10 = vcmp.eq.f32.partialorder %v194_v42, 8.507059e+37 }
 0x29f   :  { %v822_v36 = vpop.eup %821 }
 0x2a0   :  { %v186_v37 = vmul.f32 %v822_v36, %v184_v35  ;;  %vm191_vm7 = vweird.f32 %v822_v36 }
 0x2a1   :  { %vm192_vm9 = vmor %vm190_vm8, %vm191_vm7 }
 0x2a2   :  { %v187_v38 = vsub.f32 1.0, %v186_v37 }
 0x2a4   :  { %v188_v39 = vmul.f32 %v822_v36, %v187_v38 }
 0x2a6   :  { %v189_v40 = vadd.f32 %v822_v36, %v188_v39 }
 0x2a8   :  { %v193_v43 = vsel %vm192_vm9, %v822_v36, %v189_v40 }
 0x2a9   :  { %v198_v46 = vsel %vm195_vm10, %v197_v44, %v193_v43 }
 0x2aa   :  { %v205_v49 = vmul.f32 %v203_v48, %v198_v46 }
 0x307   :  { %v208_v45 = vpop.permute.xlu1 %207 }
 0x308   :  { %v210_v47 = vmul.f32 %v208_v45, %v198_v46 }
 0x30a   :  { %212 = vrot.lane.b32.xlu2 %v210_v47, %s1008_s3 }
 0x364   :  { %v213_v50 = vpop.permute.xlu2 %212 }
 0x365   :  { %v215_v51 = vadd.f32 %v213_v50, %v205_v49 }
 0x367   :  { %823 = vtanh.f32 %v215_v51 }
 0x36d   :  { %v824_v52 = vpop.eup %823 }
 0x36e   :  { %218 = vrot.lane.b32.xlu0 %v824_v52, %s1007_s17 }
 0x3e0   :  { %v219_v53 = vpop.permute.xlu0 %218 }
 0x3e1   :  { %v221_v54 = vmul.f32 %v219_v53, %v198_v46 }
 0x3e3   :  { %223 = vrot.lane.b32.xlu1 %v221_v54, %s1008_s3 }
 0x455   :  { %v224_v55 = vpop.permute.xlu1 %223 }
 0x456   :  { %227 = vst.msk [vmem:[#allocation2 + $0x4] sm:$0xf] %vm155_vm5, %v224_v55  ;;  %777 = vmatmul.msk.f32.vlgmr.msrb.gmra.mxu2 %vm157_vm6, %v224_v55 }
 0x4d9   :  { %v247_v56 = vpop.f32.mrf.mxu2 }
 0x4da   :  { %v250_v57 = vadd.f32 %v247_v56, %v1070_v5 }
 0x4dc   :  { %825 = vtanh.f32 %v250_v57  ;;  %v778_v59 = vmul.f32 -1.442695, %v250_v57 }
 0x4de   :  { %827 = vpow2.f32 %v778_v59 }
 0x4e2   :  { %v826_v58 = vpop.eup %825 }
 0x4e3   :  { %273 = vrot.lane.b32.xlu2 %v826_v58, %s1007_s17 }
 0x4e4   :  { %v828_v60 = vpop.eup %827 }
 0x4e5   :  { %v254_v61 = vadd.f32 1.0, %v828_v60 }
 0x4e7   :  { %829 = vrcp.f32 %v254_v61  ;;  %v266_v3 = vand.u32 2147483648, %v254_v61  ;;  %vm260_vm12 = vweird.f32 %v254_v61  ;;  %v264_v4 = vand.u32 2147483647, %v254_v61 }
 0x4e9   :  { %v267_v7 = vor.u32 1.1754944e-38, %v266_v3  ;;  %vm265_vm14 = vcmp.eq.f32.partialorder %v264_v4, 8.507059e+37 }
 0x4ed   :  { %v830_v62 = vpop.eup %829 }
 0x4ee   :  { %v256_v63 = vmul.f32 %v830_v62, %v254_v61  ;;  %vm261_vm11 = vweird.f32 %v830_v62 }
 0x4ef   :  { %vm262_vm13 = vmor %vm260_vm12, %vm261_vm11 }
 0x4f0   :  { %v257_v0 = vsub.f32 1.0, %v256_v63 }
 0x4f2   :  { %v258_v1 = vmul.f32 %v830_v62, %v257_v0 }
 0x4f4   :  { %v259_v2 = vadd.f32 %v830_v62, %v258_v1 }
 0x4f6   :  { %v263_v6 = vsel %vm262_vm13, %v830_v62, %v259_v2 }
 0x4f7   :  { %v268_v9 = vsel %vm265_vm14, %v267_v7, %v263_v6 }
 0x4f8   :  { %v271_v11 = vmul.f32 %v268_v9, %v215_v51 }
 0x53d   :  { %v274_v8 = vpop.permute.xlu2 %273 }
 0x53e   :  { %v276_v10 = vmul.f32 %v274_v8, %v268_v9 }
 0x540   :  { %278 = vrot.lane.b32.xlu0 %v276_v10, %s1008_s3 }
 0x5b2   :  { %v279_v12 = vpop.permute.xlu0 %278 }
 0x5b3   :  { %v281_v13 = vadd.f32 %v279_v12, %v271_v11 }
 0x5b5   :  { %831 = vtanh.f32 %v281_v13 }
 0x5bb   :  { %v832_v14 = vpop.eup %831 }
 0x5bc   :  { %284 = vrot.lane.b32.xlu1 %v832_v14, %s1007_s17 }
 0x62e   :  { %v285_v15 = vpop.permute.xlu1 %284 }
 0x62f   :  { %v287_v16 = vmul.f32 %v285_v15, %v268_v9 }
 0x631   :  { %289 = vrot.lane.b32.xlu2 %v287_v16, %s1008_s3 }
 0x68b   :  { %v290_v17 = vpop.permute.xlu2 %289 }
 0x68c   :  { %293 = vst.msk [vmem:[#allocation2 + $0x8] sm:$0xf] %vm155_vm5, %v290_v17  ;;  %779 = vmatmul.msk.f32.vlgmr.msrb.gmra.mxu3 %vm157_vm6, %v290_v17 }
 0x70f   :  { %v313_v18 = vpop.f32.mrf.mxu3 }
 0x710   :  { %v316_v19 = vadd.f32 %v313_v18, %v1070_v5 }
 0x712   :  { %833 = vtanh.f32 %v316_v19  ;;  %v780_v21 = vmul.f32 -1.442695, %v316_v19 }
 0x714   :  { %835 = vpow2.f32 %v780_v21 }
 0x718   :  { %v834_v20 = vpop.eup %833 }
 0x719   :  { %339 = vrot.lane.b32.xlu0 %v834_v20, %s1007_s17 }
 0x71a   :  { %v836_v22 = vpop.eup %835 }
 0x71b   :  { %v320_v23 = vadd.f32 1.0, %v836_v22 }
 0x71d   :  { %837 = vrcp.f32 %v320_v23  ;;  %v332_v29 = vand.u32 2147483648, %v320_v23  ;;  %vm326_vm0 = vweird.f32 %v320_v23  ;;  %v330_v30 = vand.u32 2147483647, %v320_v23 }
 0x71f   :  { %v333_v32 = vor.u32 1.1754944e-38, %v332_v29  ;;  %vm331_vm2 = vcmp.eq.f32.partialorder %v330_v30, 8.507059e+37 }
 0x723   :  { %v838_v24 = vpop.eup %837 }
 0x724   :  { %v322_v25 = vmul.f32 %v838_v24, %v320_v23  ;;  %vm327_vm15 = vweird.f32 %v838_v24 }
 0x725   :  { %vm328_vm1 = vmor %vm326_vm0, %vm327_vm15 }
 0x726   :  { %v323_v26 = vsub.f32 1.0, %v322_v25 }
 0x728   :  { %v324_v27 = vmul.f32 %v838_v24, %v323_v26 }
 0x72a   :  { %v325_v28 = vadd.f32 %v838_v24, %v324_v27 }
 0x72c   :  { %v329_v31 = vsel %vm328_vm1, %v838_v24, %v325_v28 }
 0x72d   :  { %v334_v34 = vsel %vm331_vm2, %v333_v32, %v329_v31 }
 0x72e   :  { %v337_v36 = vmul.f32 %v334_v34, %v281_v13 }
 0x78b   :  { %v340_v33 = vpop.permute.xlu0 %339 }
 0x78c   :  { %v342_v35 = vmul.f32 %v340_v33, %v334_v34 }
 0x78e   :  { %344 = vrot.lane.b32.xlu1 %v342_v35, %s1008_s3 }
 0x800   :  { %v345_v37 = vpop.permute.xlu1 %344 }
 0x801   :  { %v347_v38 = vadd.f32 %v345_v37, %v337_v36 }
 0x803   :  { %839 = vtanh.f32 %v347_v38 }
 0x809   :  { %v840_v39 = vpop.eup %839 }
 0x80a   :  { %350 = vrot.lane.b32.xlu2 %v840_v39, %s1007_s17 }
 0x864   :  { %v351_v40 = vpop.permute.xlu2 %350 }
 0x865   :  { %v353_v41 = vmul.f32 %v351_v40, %v334_v34 }
 0x867   :  { %355 = vrot.lane.b32.xlu0 %v353_v41, %s1008_s3 }
 0x8d9   :  { %v356_v42 = vpop.permute.xlu0 %355 }
 0x8da   :  { %359 = vst.msk [vmem:[#allocation2 + $0xc] sm:$0xf] %vm155_vm5, %v356_v42  ;;  %781 = vmatmul.msk.f32.vlgmr.msra.gmra.mxu0 %vm157_vm6, %v356_v42 }
 0x957   :  { %v379_v43 = vpop.f32.mrf.mxu0 }
 0x958   :  { %v382_v44 = vadd.f32 %v379_v43, %v1070_v5 }
 0x95a   :  { %841 = vtanh.f32 %v382_v44  ;;  %v782_v46 = vmul.f32 -1.442695, %v382_v44 }
 0x95c   :  { %843 = vpow2.f32 %v782_v46 }
 0x960   :  { %v842_v45 = vpop.eup %841 }
 0x961   :  { %405 = vrot.lane.b32.xlu1 %v842_v45, %s1007_s17 }
 0x962   :  { %v844_v47 = vpop.eup %843 }
 0x963   :  { %v386_v48 = vadd.f32 1.0, %v844_v47 }
 0x965   :  { %845 = vrcp.f32 %v386_v48  ;;  %v398_v54 = vand.u32 2147483648, %v386_v48  ;;  %vm392_vm4 = vweird.f32 %v386_v48  ;;  %v396_v55 = vand.u32 2147483647, %v386_v48 }
 0x967   :  { %v399_v57 = vor.u32 1.1754944e-38, %v398_v54  ;;  %vm397_vm8 = vcmp.eq.f32.partialorder %v396_v55, 8.507059e+37 }
 0x96b   :  { %v846_v49 = vpop.eup %845 }
 0x96c   :  { %v388_v50 = vmul.f32 %v846_v49, %v386_v48  ;;  %vm393_vm3 = vweird.f32 %v846_v49 }
 0x96d   :  { %vm394_vm7 = vmor %vm392_vm4, %vm393_vm3 }
 0x96e   :  { %v389_v51 = vsub.f32 1.0, %v388_v50 }
 0x970   :  { %v390_v52 = vmul.f32 %v846_v49, %v389_v51 }
 0x972   :  { %v391_v53 = vadd.f32 %v846_v49, %v390_v52 }
 0x974   :  { %v395_v56 = vsel %vm394_vm7, %v846_v49, %v391_v53  ;;  %vm644_vm7 = vcmask 1042434  }
 0x975   :  { %v400_v59 = vsel %vm397_vm8, %v399_v57, %v395_v56  ;;  %vm641_vm8 = vcmask 1041409  }
 0x976   :  { %v403_v61 = vmul.f32 %v400_v59, %v347_v38 }
 0x9d3   :  { %v406_v58 = vpop.permute.xlu1 %405 }
 0x9d4   :  { %v408_v60 = vmul.f32 %v406_v58, %v400_v59 }
 0x9d6   :  { %410 = vrot.lane.b32.xlu2 %v408_v60, %s1008_s3 }
 0xa30   :  { %v411_v62 = vpop.permute.xlu2 %410 }
 0xa31   :  { %v413_v63 = vadd.f32 %v411_v62, %v403_v61 }
 0xa33   :  { %847 = vtanh.f32 %v413_v63 }
 0xa39   :  { %v848_v0 = vpop.eup %847 }
 0xa3a   :  { %416 = vrot.lane.b32.xlu0 %v848_v0, %s1007_s17 }
 0xaac   :  { %v417_v1 = vpop.permute.xlu0 %416 }
 0xaad   :  { %v419_v2 = vmul.f32 %v417_v1, %v400_v59 }
 0xaaf   :  { %421 = vrot.lane.b32.xlu1 %v419_v2, %s1008_s3 }
 0xb21   :  { %v422_v3 = vpop.permute.xlu1 %421 }
 0xb22   :  { %425 = vst.msk [vmem:[#allocation2 + $0x10] sm:$0xf] %vm155_vm5, %v422_v3  ;;  %783 = vmatmul.msk.f32.vlgmr.msra.gmra.mxu1 %vm157_vm6, %v422_v3 }
 0xb9f   :  { %v445_v4 = vpop.f32.mrf.mxu1 }
 0xba0   :  { %v448_v6 = vadd.f32 %v445_v4, %v1070_v5 }
 0xba2   :  { %849 = vtanh.f32 %v448_v6  ;;  %v784_v8 = vmul.f32 -1.442695, %v448_v6 }
 0xba4   :  { %851 = vpow2.f32 %v784_v8 }
 0xba8   :  { %v850_v7 = vpop.eup %849 }
 0xba9   :  { %471 = vrot.lane.b32.xlu2 %v850_v7, %s1007_s17 }
 0xbaa   :  { %v852_v9 = vpop.eup %851 }
 0xbab   :  { %v452_v10 = vadd.f32 1.0, %v852_v9 }
 0xbad   :  { %853 = vrcp.f32 %v452_v10  ;;  %v464_v16 = vand.u32 2147483648, %v452_v10  ;;  %vm458_vm10 = vweird.f32 %v452_v10  ;;  %v462_v17 = vand.u32 2147483647, %v452_v10 }
 0xbaf   :  { %v465_v19 = vor.u32 1.1754944e-38, %v464_v16  ;;  %vm463_vm12 = vcmp.eq.f32.partialorder %v462_v17, 8.507059e+37  ;;  %v705_v16 = vld [vmem:[#allocation9 + $0x10] sm:$0xff]  ;;  %v704_v17 = vld [vmem:[#allocation9 + $0x8] sm:$0xff] }
 0xbb3   :  { %v854_v11 = vpop.eup %853 }
 0xbb4   :  { %v454_v12 = vmul.f32 %v854_v11, %v452_v10  ;;  %vm459_vm9 = vweird.f32 %v854_v11 }
 0xbb5   :  { %vm460_vm11 = vmor %vm458_vm10, %vm459_vm9  ;;  %vm650_vm9 = vcmask 1044484   ;;  %vm653_vm10 = vcmask 1045509  }
 0xbb6   :  { %v455_v13 = vsub.f32 1.0, %v454_v12 }
 0xbb8   :  { %v456_v14 = vmul.f32 %v854_v11, %v455_v13 }
 0xbba   :  { %v457_v15 = vadd.f32 %v854_v11, %v456_v14 }
 0xbbc   :  { %v461_v18 = vsel %vm460_vm11, %v854_v11, %v457_v15  ;;  %v706_v15 = vld [vmem:[#allocation9 + $0x18] sm:$0xff]  ;;  %vm656_vm11 = vcmask 1046534  }
 0xbbd   :  { %v466_v21 = vsel %vm463_vm12, %v465_v19, %v461_v18  ;;  %731 = vmatpush.msrb.mxu0 %v706_v15  ;;  %793 = vmatpush.msrb.mxu1 %v706_v15  ;;  %v703_v18 = vld [vmem:[#allocation9] sm:$0xff]  ;;  %v625_v19 = vld [vmem:[#allocation2 + $0x4] sm:$0xf]  ;;  %vm659_vm12 = vcmask 1047559  }
 0xbbe   :  { %v469_v23 = vmul.f32 %v466_v21, %v413_v63 }
 0xbbf   :  { %732 = vmatpush.msrb.mxu0 %v705_v16  ;;  %794 = vmatpush.msrb.mxu1 %v705_v16 }
 0xbc1   :  { %733 = vmatpush.msrb.mxu0 %v704_v17  ;;  %795 = vmatpush.msrb.mxu1 %v704_v17 }
 0xbc3   :  { %734 = vmatpush.msrb.mxu0 %v703_v18  ;;  %796 = vmatpush.msrb.mxu1 %v703_v18 }
 0xc03   :  { %v472_v20 = vpop.permute.xlu2 %471 }
 0xc04   :  { %v474_v22 = vmul.f32 %v472_v20, %v466_v21  ;;  %v624_v20 = vld [vmem:[#allocation2] sm:$0xf] }
 0xc06   :  { %476 = vrot.lane.b32.xlu0 %v474_v22, %s1008_s3  ;;  %v676_v22 = vrot.slane %v625_v19, 1 }
 0xc78   :  { %v477_v24 = vpop.permute.xlu0 %476 }
 0xc79   :  { %v479_v25 = vadd.f32 %v477_v24, %v469_v23  ;;  %v627_v24 = vld [vmem:[#allocation2 + $0xc] sm:$0xf] }
 0xc7b   :  { %855 = vtanh.f32 %v479_v25 }
 0xc81   :  { %v856_v26 = vpop.eup %855 }
 0xc82   :  { %482 = vrot.lane.b32.xlu1 %v856_v26, %s1007_s17  ;;  %v675_v26 = vrot.slane %v624_v20, 2 }
 0xcf4   :  { %v483_v27 = vpop.permute.xlu1 %482 }
 0xcf5   :  { %v485_v28 = vmul.f32 %v483_v27, %v466_v21  ;;  %v626_v21 = vld [vmem:[#allocation2 + $0x8] sm:$0xf]  ;;  %v628_v27 = vld [vmem:[#allocation2 + $0x10] sm:$0xf] }
 0xcf7   :  { %487 = vrot.lane.b32.xlu2 %v485_v28, %s1008_s3  ;;  %v643_v28 = vrot.slane %v626_v21, 6 }
 0xd51   :  { %v488_v29 = vpop.permute.xlu2 %487 }
 0xd52   :  { %491 = vst.msk [vmem:[#allocation2 + $0x14] sm:$0xf] %vm155_vm5, %v488_v29  ;;  %785 = vmatmul.msk.f32.vlgmr.msra.gmra.mxu2 %vm157_vm6, %v488_v29 }
 0xd59   :  { %v629_v29 = vld [vmem:[#allocation2 + $0x14] sm:$0xf] }
 0xdd5   :  { %v511_v30 = vpop.f32.mrf.mxu2 }
 0xdd6   :  { %v514_v31 = vadd.f32 %v511_v30, %v1070_v5 }
 0xdd8   :  { %857 = vtanh.f32 %v514_v31  ;;  %v786_v33 = vmul.f32 -1.442695, %v514_v31  ;;  %v646_v31 = vrot.slane %v627_v24, 5 }
 0xdda   :  { %859 = vpow2.f32 %v786_v33  ;;  %v679_v33 = vrot.slane %v627_v24, 7 }
 0xdde   :  { %v858_v32 = vpop.eup %857 }
 0xddf   :  { %537 = vrot.lane.b32.xlu0 %v858_v32, %s1007_s17  ;;  %v677_v32 = vsel %vm641_vm8, %v676_v22, %v675_v26 }
 0xde0   :  { %v860_v34 = vpop.eup %859 }
 0xde1   :  { %v518_v35 = vadd.f32 1.0, %v860_v34 }
 0xde3   :  { %861 = vrcp.f32 %v518_v35  ;;  %v530_v41 = vand.u32 2147483648, %v518_v35  ;;  %vm524_vm14 = vweird.f32 %v518_v35  ;;  %v528_v42 = vand.u32 2147483647, %v518_v35 }
 0xde5   :  { %v531_v44 = vor.u32 1.1754944e-38, %v530_v41  ;;  %vm529_vm0 = vcmp.eq.f32.partialorder %v528_v42, 8.507059e+37 }
 0xde9   :  { %v862_v36 = vpop.eup %861 }
 0xdea   :  { %v520_v37 = vmul.f32 %v862_v36, %v518_v35  ;;  %vm525_vm13 = vweird.f32 %v862_v36  ;;  %v649_v35 = vrot.slane %v628_v27, 4 }
 0xdeb   :  { %vm526_vm15 = vmor %vm524_vm14, %vm525_vm13 }
 0xdec   :  { %v521_v38 = vsub.f32 1.0, %v520_v37  ;;  %v681_v37 = vrot.slane %v628_v27, 6 }
 0xdee   :  { %v522_v39 = vmul.f32 %v862_v36, %v521_v38 }
 0xdf0   :  { %v523_v40 = vadd.f32 %v862_v36, %v522_v39  ;;  %v652_v39 = vrot.slane %v629_v29, 3 }
 0xdf2   :  { %v527_v43 = vsel %vm526_vm15, %v862_v36, %v523_v40  ;;  %v678_v36 = vsel %vm644_vm7, %v626_v21, %v677_v32  ;;  %v683_v40 = vrot.slane %v629_v29, 5 }
 0xdf3   :  { %v532_v46 = vsel %vm529_vm0, %v531_v44, %v527_v43 }
 0xdf4   :  { %v535_v48 = vmul.f32 %v532_v46, %v479_v25  ;;  %v640_v25 = vrot.slane %v625_v19, 7 }
 0xdf6   :  { %v642_v34 = vsel %vm641_vm8, %v640_v25, %v624_v20 }
 0xdf7   :  { %v645_v38 = vsel %vm644_vm7, %v643_v28, %v642_v34 }
 0xe51   :  { %v538_v45 = vpop.permute.xlu0 %537 }
 0xe52   :  { %v540_v47 = vmul.f32 %v538_v45, %v532_v46  ;;  %v661_v45 = vrot.slane %v624_v20, 1 }
 0xe54   :  { %542 = vrot.lane.b32.xlu1 %v540_v47, %s1008_s3 }
 0xec6   :  { %v543_v49 = vpop.permute.xlu1 %542 }
 0xec7   :  { %v545_v50 = vadd.f32 %v543_v49, %v535_v48  ;;  %v690_v49 = vrot.slane %v625_v19, 2 }
 0xec9   :  { %863 = vtanh.f32 %v545_v50 }
 0xecf   :  { %v864_v51 = vpop.eup %863 }
 0xed0   :  { %548 = vrot.lane.b32.xlu2 %v864_v51, %s1007_s17 }
 0xf2a   :  { %v549_v52 = vpop.permute.xlu2 %548 }
 0xf2b   :  { %v551_v53 = vmul.f32 %v549_v52, %v532_v46 }
 0xf2d   :  { %553 = vrot.lane.b32.xlu0 %v551_v53, %s1008_s3 }
 0xf9f   :  { %v554_v54 = vpop.permute.xlu0 %553 }
 0xfa0   :  { %557 = vst.msk [vmem:[#allocation2 + $0x18] sm:$0xf] %vm155_vm5, %v554_v54  ;;  %787 = vmatmul.msk.f32.vlgmr.msra.gmra.mxu3 %vm157_vm6, %v554_v54 }
 0xfa7   :  { %v630_v30 = vld [vmem:[#allocation2 + $0x18] sm:$0xf] }
 0xfa8   :  { %v655_v41 = vrot.slane %v630_v30, 2  ;;  %v685_v42 = vrot.slane %v630_v30, 4 }
0x1023   :  { %v577_v55 = vpop.f32.mrf.mxu3 }
0x1024   :  { %v580_v56 = vadd.f32 %v577_v55, %v1070_v5 }
0x1026   :  { %865 = vtanh.f32 %v580_v56  ;;  %v788_v58 = vmul.f32 -1.442695, %v580_v56  ;;  %v663_v56 = vrot.slane %v626_v21, 7 }
0x1028   :  { %867 = vpow2.f32 %v788_v58 }
0x102c   :  { %v866_v57 = vpop.eup %865 }
0x102d   :  { %603 = vrot.lane.b32.xlu1 %v866_v57, %s1007_s17  ;;  %v692_v57 = vrot.slane %v626_v21, 1 }
0x102e   :  { %v868_v59 = vpop.eup %867 }
0x102f   :  { %v584_v60 = vadd.f32 1.0, %v868_v59 }
0x1031   :  { %869 = vrcp.f32 %v584_v60  ;;  %v596_v2 = vand.u32 2147483648, %v584_v60  ;;  %vm590_vm2 = vweird.f32 %v584_v60  ;;  %v594_v3 = vand.u32 2147483647, %v584_v60 }
0x1033   :  { %v597_v4 = vor.u32 1.1754944e-38, %v596_v2  ;;  %vm595_vm4 = vcmp.eq.f32.partialorder %v594_v3, 8.507059e+37  ;;  %v697_v3 = vrot.slane %v629_v29, 6 }
0x1037   :  { %v870_v61 = vpop.eup %869 }
0x1038   :  { %v586_v62 = vmul.f32 %v870_v61, %v584_v60  ;;  %vm591_vm1 = vweird.f32 %v870_v61  ;;  %v665_v60 = vrot.slane %v627_v24, 6 }
0x1039   :  { %vm592_vm3 = vmor %vm590_vm2, %vm591_vm1 }
0x103a   :  { %v587_v63 = vsub.f32 1.0, %v586_v62  ;;  %v667_v62 = vrot.slane %v628_v27, 5 }
0x103c   :  { %v588_v0 = vmul.f32 %v870_v61, %v587_v63  ;;  %v695_v63 = vrot.slane %v628_v27, 7 }
0x103e   :  { %v589_v1 = vadd.f32 %v870_v61, %v588_v0  ;;  %v662_v0 = vsel %vm641_vm8, %v625_v19, %v661_v45 }
0x1040   :  { %v593_v5 = vsel %vm592_vm3, %v870_v61, %v589_v1  ;;  %v689_v61 = vrot.slane %v624_v20, 3  ;;  %v669_v1 = vrot.slane %v629_v29, 4  ;;  %v808_v20 = vld [vmem:[%s1173_s5] ss:$0 sm:$0xff] }
0x1041   :  { %v598_v7 = vsel %vm595_vm4, %v597_v4, %v593_v5  ;;  %v664_v5 = vsel %vm644_vm7, %v663_v56, %v662_v0  ;;  %v671_v4 = vrot.slane %v630_v30, 3 }
0x1042   :  { %v601_v9 = vmul.f32 %v598_v7, %v545_v50  ;;  %v691_v2 = vsel %vm641_vm8, %v690_v49, %v689_v61 }
0x109f   :  { %v604_v6 = vpop.permute.xlu1 %603 }
0x10a0   :  { %v606_v8 = vmul.f32 %v604_v6, %v598_v7  ;;  %v693_v6 = vsel %vm644_vm7, %v692_v57, %v691_v2 }
0x10a2   :  { %608 = vrot.lane.b32.xlu2 %v606_v8, %s1008_s3 }
0x10fc   :  { %v609_v10 = vpop.permute.xlu2 %608 }
0x10fd   :  { %v611_v11 = vadd.f32 %v609_v10, %v601_v9 }
0x10ff   :  { %871 = vtanh.f32 %v611_v11 }
0x1105   :  { %v872_v12 = vpop.eup %871 }
0x1106   :  { %614 = vrot.lane.b32.xlu0 %v872_v12, %s1007_s17 }
0x1178   :  { %v615_v13 = vpop.permute.xlu0 %614 }
0x1179   :  { %v617_v14 = vmul.f32 %v615_v13, %v598_v7  ;;  %v699_v7 = vrot.slane %v630_v30, 5 }
0x117b   :  { %619 = vrot.lane.b32.xlu1 %v617_v14, %s1008_s3 }
0x11ed   :  { %v620_v23 = vpop.permute.xlu1 %619 }
0x11ee   :  { %623 = vst.msk [vmem:[#allocation2 + $0x1c] sm:$0xf] %vm155_vm5, %v620_v23  ;;  %vm647_vm5 = vcmask 1043459  }
0x11ef   :  { %v648_v43 = vsel %vm647_vm5, %v646_v31, %v645_v38  ;;  %v680_v44 = vsel %vm647_vm5, %v679_v33, %v678_v36  ;;  %v666_v8 = vsel %vm647_vm5, %v665_v60, %v664_v5  ;;  %v694_v10 = vsel %vm647_vm5, %v627_v24, %v693_v6 }
0x11f0   :  { %v651_v47 = vsel %vm650_vm9, %v649_v35, %v648_v43  ;;  %v682_v48 = vsel %vm650_vm9, %v681_v37, %v680_v44  ;;  %v668_v12 = vsel %vm650_vm9, %v667_v62, %v666_v8  ;;  %v696_v13 = vsel %vm650_vm9, %v695_v63, %v694_v10 }
0x11f1   :  { %v654_v50 = vsel %vm653_vm10, %v652_v39, %v651_v47  ;;  %v684_v52 = vsel %vm653_vm10, %v683_v40, %v682_v48  ;;  %v670_v14 = vsel %vm653_vm10, %v669_v1, %v668_v12  ;;  %v698_v15 = vsel %vm653_vm10, %v697_v3, %v696_v13 }
0x11f2   :  { %v657_v54 = vsel %vm656_vm11, %v655_v41, %v654_v50  ;;  %v686_v55 = vsel %vm656_vm11, %v685_v42, %v684_v52  ;;  %v672_v16 = vsel %vm656_vm11, %v671_v4, %v670_v14  ;;  %v700_v17 = vsel %vm656_vm11, %v699_v7, %v698_v15 }
0x11f5   :  { %v631_v46 = vld [vmem:[#allocation2 + $0x1c] sm:$0xf] }
0x11f6   :  { %v658_v51 = vrot.slane %v631_v46, 1  ;;  %v687_v53 = vrot.slane %v631_v46, 3  ;;  %v673_v9 = vrot.slane %v631_v46, 2  ;;  %v701_v11 = vrot.slane %v631_v46, 4 }
0x11f8   :  { %v660_v58 = vsel %vm659_vm12, %v658_v51, %v657_v54  ;;  %v688_v59 = vsel %vm659_vm12, %v687_v53, %v686_v55  ;;  %v674_v18 = vsel %vm659_vm12, %v673_v9, %v672_v16  ;;  %v702_v19 = vsel %vm659_vm12, %v701_v11, %v700_v17 }
0x11f9   :  { %789 = vmatmul.msk.f32.vlgmr.msrb.gmra.mxu0 %vm157_vm6, %v660_v58  ;;  %791 = vmatmul.msk.f32.vlgmr.msrb.gmra.mxu1 %vm157_vm6, %v688_v59 }
0x1201   :  { %790 = vmatmul.msk.f32.gmra.mxu0 %vm157_vm6, %v674_v18  ;;  %792 = vmatmul.msk.f32.gmra.mxu1 %vm157_vm6, %v702_v19 }
0x1276   :  { %v736_v21 = vpop.f32.mrf.mxu0  ;;  %v742_v22 = vpop.f32.mrf.mxu1 }
0x1277   :  { %v737_v23 = vadd.f32 %v808_v20, %v736_v21  ;;  %v743_v24 = vadd.f32 %v808_v20, %v742_v22 }
0x1279   :  { %748 = vst [vmem:[#allocation11] sm:$0xff] %v737_v23 }
0x127a   :  { %750 = vst [vmem:[#allocation11 + $0x10] sm:$0xff] %v743_v24 }
0x127e   :  { %v739_v25 = vpop.f32.mrf.mxu0  ;;  %v745_v26 = vpop.f32.mrf.mxu1 }
0x127f   :  { %v740_v27 = vadd.f32 %v808_v20, %v739_v25  ;;  %v746_v28 = vadd.f32 %v808_v20, %v745_v26 }
0x1281   :  { %749 = vst [vmem:[#allocation11 + $0x8] sm:$0xff] %v740_v27 }
0x1282   :  { %751 = vst [vmem:[#allocation11 + $0x18] sm:$0xff] %v746_v28 }
0x1283   :  { %764 = dma.vmem_to_hbm [thread:$0]  %s757_s22, 512, %s759_s25, [#allocation5], %s1002_s29, %s1002_s29, %s1003_s30  }
0x1284   :  { %999 = dma.done.wait [#allocation5], 512  }
0x1285   :  { %1000 = vsyncadd [#allocation5], 4294966784 }
0x1286   :  { %769 = vsyncpa [#allocation4], 1 }
0x1287   :  { %770 = vsyncpa [#allocation7], 1 }
0x1288   :  { %771 = vsyncpa [#allocation10], 1 }
0x1289   :  { %772 = vsyncpa [#allocation5], 1 }

</bundles_post_ra>
